<compile_context>
chip_gen: v5e
topology: v5e:2x2
jax: 0.10.0
libtpu: 0.0.40
codegen_flags: <defaults>
</compile_context>

<pallas_src>
import functools

import jax
import jax.numpy as jnp
from jax.experimental import pallas as pl
from jax.experimental.pallas import tpu as pltpu


LANE = 128        # lane width: feature (output) dims padded to this for lane-dense stores
ROW_TILE = 256    # target node-row tile; bounds the A block (R*TN*Npad*2B, double-buffered)


def _round_up(x, m):
    return ((x + m - 1) // m) * m


def _pad_to(x, shape):
    return jnp.pad(x, [(0, t - s) for s, t in zip(x.shape, shape)])


# ----------------------------- Pallas kernel --------------------------------

def rgcn_layer_kernel(a_ref, xb_ref, x_ref, s_ref, wcomp_ref,
                      wself_ref, wa_msg_ref, wa_cur_ref, wa_sub_ref,
                      ba_ref, bias_ref, o_ref, *, num_rels, num_bases):
    """One RGCN basis layer for one tile of node rows.

    a_ref  : [R, TN, Np]  bf16   adjacency rows for this tile, all relations
    xb_ref : [NB, Np, Dp] bf16   X @ bases_b (hoisted), resident across tiles
    x_ref  : [TN, Din]    f32    node-feature rows (self-loop path)
    s_ref  : [TN, NS]     f32    substructure counts rows
    wcomp_ref : [R, NB]   f32    basis coefficients, in SMEM (scalar reads)
    """
    tn, dp = o_ref.shape
    acc = jnp.zeros((tn, dp), jnp.float32)

    # Relation reduction, fully unrolled (R small & static). For each relation:
    # form X W_r on the VPU from the hoisted X@bases stream, then one deep
    # (K = Np) MXU matmul against the bf16 adjacency rows.
    for r in range(num_rels):
        xw = wcomp_ref[r, 0] * xb_ref[0].astype(jnp.float32)
        for b in range(1, num_bases):
            xw = xw + wcomp_ref[r, b] * xb_ref[b].astype(jnp.float32)
        acc = acc + jnp.dot(a_ref[r], xw.astype(jnp.bfloat16),
                            preferred_element_type=jnp.float32)

    # Self-loop path + shared MLP aggregator + layer bias (lane-dense width Dp).
    curr = jnp.dot(x_ref[...], wself_ref[...], preferred_element_type=jnp.float32)
    z = (jnp.dot(acc, wa_msg_ref[...], preferred_element_type=jnp.float32)
         + jnp.dot(curr, wa_cur_ref[...], preferred_element_type=jnp.float32)
         + jnp.dot(s_ref[...], wa_sub_ref[...], preferred_element_type=jnp.float32)
         + ba_ref[...])
    new_emb = jnp.maximum(z, 0.0)                              # MLPAggregator ReLU
    o_ref[...] = jnp.maximum(new_emb + bias_ref[...], 0.0)     # layer bias + activation ReLU


# ------------------------------ JAX wrappers --------------------------------

def rgcn_layer(A, x, xb, sub, wcomp, wself, wa_msg, wa_cur, wa_sub, bagg, bias, *, tn):
    R, n_pad, _ = A.shape
    nb = xb.shape[0]
    d_in = x.shape[1]
    d_pad = wself.shape[1]
    ns = sub.shape[1]
    kernel = functools.partial(rgcn_layer_kernel, num_rels=R, num_bases=nb)
    return pl.pallas_call(
        kernel,
        out_shape=jax.ShapeDtypeStruct((n_pad, d_pad), jnp.float32),
        grid=(n_pad // tn,),
        in_specs=[
            pl.BlockSpec((R, tn, n_pad), lambda i: (0, i, 0)),      # A rows tile (bf16)
            pl.BlockSpec((nb, n_pad, d_pad), lambda i: (0, 0, 0)),  # X @ bases (bf16, resident)
            pl.BlockSpec((tn, d_in), lambda i: (i, 0)),             # X rows (self path)
            pl.BlockSpec((tn, ns), lambda i: (i, 0)),               # substructure rows
            pl.BlockSpec(memory_space=pltpu.MemorySpace.SMEM),      # wcomp [R, NB] scalars
            pl.BlockSpec((d_in, d_pad), lambda i: (0, 0)),          # W_self
            pl.BlockSpec((d_pad, d_pad), lambda i: (0, 0)),         # W_agg (msg block)
            pl.BlockSpec((d_pad, d_pad), lambda i: (0, 0)),         # W_agg (curr block)
            pl.BlockSpec((ns, d_pad), lambda i: (0, 0)),            # W_agg (sub block)
            pl.BlockSpec((1, d_pad), lambda i: (0, 0)),             # b_agg
            pl.BlockSpec((1, d_pad), lambda i: (0, 0)),             # layer bias
        ],
        out_specs=pl.BlockSpec((tn, d_pad), lambda i: (i, 0)),
        compiler_params=pltpu.CompilerParams(
            dimension_semantics=("parallel",),
            vmem_limit_bytes=48 * 1024 * 1024),
    )(A, xb, x, sub, wcomp, wself, wa_msg, wa_cur, wa_sub, bagg, bias)


def rgcn_2_forward(feat, A, sub, params, *, emb_dim):
    """Full RGCN_2 forward: input layer, hidden layer, BatchNorm + residual.

    Node axis is zero-padded to the row tile and feature/output dims to 128 lanes;
    padded rows/columns stay exactly zero through both layers and are sliced off
    before BatchNorm, so the math matches the unpadded computation.
    """
    N, inp_dim = feat.shape
    R = A.shape[0]
    ns = sub.shape[1]
    nb = params['bases0'].shape[0]

    # ---- static tiling / padding config ----
    n8 = _round_up(N, 8)
    if n8 >= ROW_TILE:
        tn, n_pad = ROW_TILE, _round_up(N, ROW_TILE)
    else:
        tn = n_pad = n8
    d_pad = _round_up(emb_dim, LANE)

    # ---- graph inputs: pad + stream adjacency in bf16 (dominant HBM traffic) ----
    A_p = _pad_to(A, (R, n_pad, n_pad)).astype(jnp.bfloat16)
    feat_p = _pad_to(feat, (n_pad, inp_dim))
    sub_p = _pad_to(sub, (n_pad, ns))

    # ---- parameters: zero-pad output dims to the lane width ----
    bases0 = _pad_to(params['bases0'], (nb, inp_dim, d_pad))
    wself0 = _pad_to(params['wself0'], (inp_dim, d_pad))
    bias0 = _pad_to(params['bias0'], (1, d_pad))
    bases1 = _pad_to(params['bases1'], (nb, d_pad, d_pad))
    wself1 = _pad_to(params['wself1'], (d_pad, d_pad))
    bias1 = _pad_to(params['bias1'], (1, d_pad))
    wa_msg = _pad_to(params['wa_msg'], (d_pad, d_pad))
    wa_cur = _pad_to(params['wa_cur'], (d_pad, d_pad))
    wa_sub = _pad_to(params['wa_sub'], (ns, d_pad))
    bagg = _pad_to(params['bagg'], (1, d_pad))

    # Basis reorder (hoisted): XB_b = X @ bases_b (NB tiny matmuls); the per-relation
    # combination with wcomp[r,b] happens in-kernel on the VPU, so only NB (< R)
    # projected copies of X are streamed instead of R.
    xb0 = jnp.einsum('nd,bdo->bno', feat_p, bases0).astype(jnp.bfloat16)
    h0 = rgcn_layer(A_p, feat_p, xb0, sub_p, params['wcomp0'], wself0,
                    wa_msg, wa_cur, wa_sub, bagg, bias0, tn=tn)

    xb1 = jnp.einsum('nd,bdo->bno', h0, bases1).astype(jnp.bfloat16)
    h1 = rgcn_layer(A_p, h0, xb1, sub_p, params['wcomp1'], wself1,
                    wa_msg, wa_cur, wa_sub, bagg, bias1, tn=tn)

    # h_in = node embeddings captured before the last layer (= output of layer 0)
    h_in = h0[:N, :emb_dim]
    h = h1[:N, :emb_dim]

    # BatchNorm1d (training-mode batch stats, eps=1e-5) + residual in plain jnp:
    # it needs full-column statistics over all N nodes (cannot live inside a
    # row-tiled kernel) and is trivially small, so XLA fuses it for free.
    mean = jnp.mean(h, axis=0, keepdims=True)
    var = jnp.mean((h - mean) ** 2, axis=0, keepdims=True)
    hn = (h - mean) * jax.lax.rsqrt(var + 1e-5)
    hn = hn * params['bn_gamma'] + params['bn_beta']
    return h_in + hn


# --------------------------------- main --------------------------------------

if __name__ == "__main__":
    N, R, INP, EMB, NSUB, NB = 16, 4, 8, 32, 4, 2   # nodes, rels, inp_dim, emb_dim, substructs, bases

    key = jax.random.PRNGKey(0)
    ks = jax.random.split(key, 12)

    # graph inputs
    feat = jax.random.normal(ks[0], (N, INP), jnp.float32)          # node features
    sub = jax.random.normal(ks[1], (N, NSUB), jnp.float32)          # substructure counts
    mask = (jax.random.uniform(ks[2], (R, N, N)) < 0.3).astype(jnp.float32)
    mask = mask.at[0].set(jnp.maximum(mask[0], jnp.eye(N, dtype=jnp.float32)))  # in-degree > 0
    indeg = jnp.sum(mask, axis=(0, 2))                              # [N]
    A = mask * (1.0 / indeg)[None, :, None]                         # norm folded into adjacency

    # deterministic parameters
    params = {
        'bases0': 0.1 * jax.random.normal(ks[3], (NB, INP, EMB), jnp.float32),
        'wcomp0': 0.1 * jax.random.normal(ks[4], (R, NB), jnp.float32),
        'wself0': 0.1 * jax.random.normal(ks[5], (INP, EMB), jnp.float32),
        'bias0': jnp.zeros((1, EMB), jnp.float32),
        'bases1': 0.1 * jax.random.normal(ks[6], (NB, EMB, EMB), jnp.float32),
        'wcomp1': 0.1 * jax.random.normal(ks[7], (R, NB), jnp.float32),
        'wself1': 0.1 * jax.random.normal(ks[8], (EMB, EMB), jnp.float32),
        'bias1': jnp.zeros((1, EMB), jnp.float32),
        # shared MLP aggregator: Linear(2*emb + num_substructure -> emb), split by input blocks
        'wa_msg': 0.1 * jax.random.normal(ks[9], (EMB, EMB), jnp.float32),
        'wa_cur': 0.1 * jax.random.normal(ks[10], (EMB, EMB), jnp.float32),
        'wa_sub': 0.1 * jax.random.normal(ks[11], (NSUB, EMB), jnp.float32),
        'bagg': jnp.zeros((1, EMB), jnp.float32),
        # BatchNorm1d(emb_dim) default init
        'bn_gamma': jnp.ones((1, EMB), jnp.float32),
        'bn_beta': jnp.zeros((1, EMB), jnp.float32),
    }

    fwd = jax.jit(functools.partial(rgcn_2_forward, emb_dim=EMB))
    out = fwd(feat, A, sub, params)
    jax.block_until_ready(out)
    assert out.shape == (N, EMB) and out.dtype == jnp.float32
    print("KERNEL_OK")
</pallas_src>

<mosaic_0001>
module attributes {stable_mosaic.version = 11 : i64} {
  func.func @rgcn_layer_kernel(%arg0: i32, %arg1: memref<4x16x16xbf16, #tpu.memory_space<vmem>>, %arg2: memref<2x16x128xbf16, #tpu.memory_space<vmem>>, %arg3: memref<16x8xf32, #tpu.memory_space<vmem>>, %arg4: memref<16x4xf32, #tpu.memory_space<vmem>>, %arg5: memref<4x2xf32, #tpu.memory_space<smem>>, %arg6: memref<8x128xf32, #tpu.memory_space<vmem>>, %arg7: memref<128x128xf32, #tpu.memory_space<vmem>>, %arg8: memref<128x128xf32, #tpu.memory_space<vmem>>, %arg9: memref<4x128xf32, #tpu.memory_space<vmem>>, %arg10: memref<1x128xf32, #tpu.memory_space<vmem>>, %arg11: memref<1x128xf32, #tpu.memory_space<vmem>>, %arg12: memref<16x128xf32, #tpu.memory_space<vmem>>) attributes {dimension_semantics = [#tpu.dimension_semantics<parallel>], iteration_bounds = array<i64: 1>, scalar_prefetch = 0 : i64, scratch_operands = 0 : i64, tpu.core_type = #tpu.core_type<tc>, window_params = [{transform_indices = @transform_0, window_bounds = array<i64: 4, 16, 16>}, {pipeline_mode = #tpu.pipeline_mode<synchronous>, transform_indices = @transform_1, window_bounds = array<i64: 2, 16, 128>}, {transform_indices = @transform_2, window_bounds = array<i64: 16, 8>}, {transform_indices = @transform_3, window_bounds = array<i64: 16, 4>}, {transform_indices = @transform_4, window_bounds = array<i64: 4, 2>}, {pipeline_mode = #tpu.pipeline_mode<synchronous>, transform_indices = @transform_5, window_bounds = array<i64: 8, 128>}, {pipeline_mode = #tpu.pipeline_mode<synchronous>, transform_indices = @transform_6, window_bounds = array<i64: 128, 128>}, {pipeline_mode = #tpu.pipeline_mode<synchronous>, transform_indices = @transform_7, window_bounds = array<i64: 128, 128>}, {pipeline_mode = #tpu.pipeline_mode<synchronous>, transform_indices = @transform_8, window_bounds = array<i64: 4, 128>}, {pipeline_mode = #tpu.pipeline_mode<synchronous>, transform_indices = @transform_9, window_bounds = array<i64: 1, 128>}, {pipeline_mode = #tpu.pipeline_mode<synchronous>, transform_indices = @transform_10, window_bounds = array<i64: 1, 128>}, {transform_indices = @transform_11, window_bounds = array<i64: 16, 128>}]} {
    %cst = arith.constant 0.000000e+00 : f32
    %0 = vector.broadcast %cst : f32 to vector<16x128xf32>
    %c0 = arith.constant 0 : index
    %c0_0 = arith.constant 0 : index
    %1 = memref.load %arg5[%c0, %c0_0] : memref<4x2xf32, #tpu.memory_space<smem>>
    %c0_1 = arith.constant 0 : index
    %c0_2 = arith.constant 0 : index
    %c0_3 = arith.constant 0 : index
    %2 = vector.load %arg2[%c0_1, %c0_2, %c0_3] : memref<2x16x128xbf16, #tpu.memory_space<vmem>>, vector<1x16x128xbf16>
    %3 = vector.shape_cast %2 : vector<1x16x128xbf16> to vector<16x128xbf16>
    %4 = arith.extf %3 : vector<16x128xbf16> to vector<16x128xf32>
    %5 = vector.broadcast %1 : f32 to vector<16x128xf32>
    %6 = arith.mulf %5, %4 : vector<16x128xf32>
    %c0_4 = arith.constant 0 : index
    %c1 = arith.constant 1 : index
    %7 = memref.load %arg5[%c0_4, %c1] : memref<4x2xf32, #tpu.memory_space<smem>>
    %c1_5 = arith.constant 1 : index
    %c0_6 = arith.constant 0 : index
    %c0_7 = arith.constant 0 : index
    %8 = vector.load %arg2[%c1_5, %c0_6, %c0_7] : memref<2x16x128xbf16, #tpu.memory_space<vmem>>, vector<1x16x128xbf16>
    %9 = vector.shape_cast %8 : vector<1x16x128xbf16> to vector<16x128xbf16>
    %10 = arith.extf %9 : vector<16x128xbf16> to vector<16x128xf32>
    %11 = vector.broadcast %7 : f32 to vector<16x128xf32>
    %12 = arith.mulf %11, %10 : vector<16x128xf32>
    %13 = arith.addf %6, %12 : vector<16x128xf32>
    %c0_8 = arith.constant 0 : index
    %c0_9 = arith.constant 0 : index
    %c0_10 = arith.constant 0 : index
    %14 = vector.load %arg1[%c0_8, %c0_9, %c0_10] : memref<4x16x16xbf16, #tpu.memory_space<vmem>>, vector<1x16x16xbf16>
    %15 = vector.shape_cast %14 : vector<1x16x16xbf16> to vector<16x16xbf16>
    %16 = arith.truncf %13 : vector<16x128xf32> to vector<16x128xbf16>
    %cst_11 = arith.constant dense<0.000000e+00> : vector<16x128xf32>
    %17 = tpu.matmul %15, %16, %cst_11 {dimension_numbers = #tpu.dot_dimension_numbers<[1], [0], [0], [1], [0, 0, 1, 1], [], []>} : vector<16x16xbf16>, vector<16x128xbf16>, vector<16x128xf32> -> vector<16x128xf32>
    %18 = arith.addf %0, %17 : vector<16x128xf32>
    %c1_12 = arith.constant 1 : index
    %c0_13 = arith.constant 0 : index
    %19 = memref.load %arg5[%c1_12, %c0_13] : memref<4x2xf32, #tpu.memory_space<smem>>
    %c0_14 = arith.constant 0 : index
    %c0_15 = arith.constant 0 : index
    %c0_16 = arith.constant 0 : index
    %20 = vector.load %arg2[%c0_14, %c0_15, %c0_16] : memref<2x16x128xbf16, #tpu.memory_space<vmem>>, vector<1x16x128xbf16>
    %21 = vector.shape_cast %20 : vector<1x16x128xbf16> to vector<16x128xbf16>
    %22 = arith.extf %21 : vector<16x128xbf16> to vector<16x128xf32>
    %23 = vector.broadcast %19 : f32 to vector<16x128xf32>
    %24 = arith.mulf %23, %22 : vector<16x128xf32>
    %c1_17 = arith.constant 1 : index
    %c1_18 = arith.constant 1 : index
    %25 = memref.load %arg5[%c1_17, %c1_18] : memref<4x2xf32, #tpu.memory_space<smem>>
    %c1_19 = arith.constant 1 : index
    %c0_20 = arith.constant 0 : index
    %c0_21 = arith.constant 0 : index
    %26 = vector.load %arg2[%c1_19, %c0_20, %c0_21] : memref<2x16x128xbf16, #tpu.memory_space<vmem>>, vector<1x16x128xbf16>
    %27 = vector.shape_cast %26 : vector<1x16x128xbf16> to vector<16x128xbf16>
    %28 = arith.extf %27 : vector<16x128xbf16> to vector<16x128xf32>
    %29 = vector.broadcast %25 : f32 to vector<16x128xf32>
    %30 = arith.mulf %29, %28 : vector<16x128xf32>
    %31 = arith.addf %24, %30 : vector<16x128xf32>
    %c1_22 = arith.constant 1 : index
    %c0_23 = arith.constant 0 : index
    %c0_24 = arith.constant 0 : index
    %32 = vector.load %arg1[%c1_22, %c0_23, %c0_24] : memref<4x16x16xbf16, #tpu.memory_space<vmem>>, vector<1x16x16xbf16>
    %33 = vector.shape_cast %32 : vector<1x16x16xbf16> to vector<16x16xbf16>
    %34 = arith.truncf %31 : vector<16x128xf32> to vector<16x128xbf16>
    %cst_25 = arith.constant dense<0.000000e+00> : vector<16x128xf32>
    %35 = tpu.matmul %33, %34, %cst_25 {dimension_numbers = #tpu.dot_dimension_numbers<[1], [0], [0], [1], [0, 0, 1, 1], [], []>} : vector<16x16xbf16>, vector<16x128xbf16>, vector<16x128xf32> -> vector<16x128xf32>
    %36 = arith.addf %18, %35 : vector<16x128xf32>
    %c2 = arith.constant 2 : index
    %c0_26 = arith.constant 0 : index
    %37 = memref.load %arg5[%c2, %c0_26] : memref<4x2xf32, #tpu.memory_space<smem>>
    %c0_27 = arith.constant 0 : index
    %c0_28 = arith.constant 0 : index
    %c0_29 = arith.constant 0 : index
    %38 = vector.load %arg2[%c0_27, %c0_28, %c0_29] : memref<2x16x128xbf16, #tpu.memory_space<vmem>>, vector<1x16x128xbf16>
    %39 = vector.shape_cast %38 : vector<1x16x128xbf16> to vector<16x128xbf16>
    %40 = arith.extf %39 : vector<16x128xbf16> to vector<16x128xf32>
    %41 = vector.broadcast %37 : f32 to vector<16x128xf32>
    %42 = arith.mulf %41, %40 : vector<16x128xf32>
    %c2_30 = arith.constant 2 : index
    %c1_31 = arith.constant 1 : index
    %43 = memref.load %arg5[%c2_30, %c1_31] : memref<4x2xf32, #tpu.memory_space<smem>>
    %c1_32 = arith.constant 1 : index
    %c0_33 = arith.constant 0 : index
    %c0_34 = arith.constant 0 : index
    %44 = vector.load %arg2[%c1_32, %c0_33, %c0_34] : memref<2x16x128xbf16, #tpu.memory_space<vmem>>, vector<1x16x128xbf16>
    %45 = vector.shape_cast %44 : vector<1x16x128xbf16> to vector<16x128xbf16>
    %46 = arith.extf %45 : vector<16x128xbf16> to vector<16x128xf32>
    %47 = vector.broadcast %43 : f32 to vector<16x128xf32>
    %48 = arith.mulf %47, %46 : vector<16x128xf32>
    %49 = arith.addf %42, %48 : vector<16x128xf32>
    %c2_35 = arith.constant 2 : index
    %c0_36 = arith.constant 0 : index
    %c0_37 = arith.constant 0 : index
    %50 = vector.load %arg1[%c2_35, %c0_36, %c0_37] : memref<4x16x16xbf16, #tpu.memory_space<vmem>>, vector<1x16x16xbf16>
    %51 = vector.shape_cast %50 : vector<1x16x16xbf16> to vector<16x16xbf16>
    %52 = arith.truncf %49 : vector<16x128xf32> to vector<16x128xbf16>
    %cst_38 = arith.constant dense<0.000000e+00> : vector<16x128xf32>
    %53 = tpu.matmul %51, %52, %cst_38 {dimension_numbers = #tpu.dot_dimension_numbers<[1], [0], [0], [1], [0, 0, 1, 1], [], []>} : vector<16x16xbf16>, vector<16x128xbf16>, vector<16x128xf32> -> vector<16x128xf32>
    %54 = arith.addf %36, %53 : vector<16x128xf32>
    %c3 = arith.constant 3 : index
    %c0_39 = arith.constant 0 : index
    %55 = memref.load %arg5[%c3, %c0_39] : memref<4x2xf32, #tpu.memory_space<smem>>
    %c0_40 = arith.constant 0 : index
    %c0_41 = arith.constant 0 : index
    %c0_42 = arith.constant 0 : index
    %56 = vector.load %arg2[%c0_40, %c0_41, %c0_42] : memref<2x16x128xbf16, #tpu.memory_space<vmem>>, vector<1x16x128xbf16>
    %57 = vector.shape_cast %56 : vector<1x16x128xbf16> to vector<16x128xbf16>
    %58 = arith.extf %57 : vector<16x128xbf16> to vector<16x128xf32>
    %59 = vector.broadcast %55 : f32 to vector<16x128xf32>
    %60 = arith.mulf %59, %58 : vector<16x128xf32>
    %c3_43 = arith.constant 3 : index
    %c1_44 = arith.constant 1 : index
    %61 = memref.load %arg5[%c3_43, %c1_44] : memref<4x2xf32, #tpu.memory_space<smem>>
    %c1_45 = arith.constant 1 : index
    %c0_46 = arith.constant 0 : index
    %c0_47 = arith.constant 0 : index
    %62 = vector.load %arg2[%c1_45, %c0_46, %c0_47] : memref<2x16x128xbf16, #tpu.memory_space<vmem>>, vector<1x16x128xbf16>
    %63 = vector.shape_cast %62 : vector<1x16x128xbf16> to vector<16x128xbf16>
    %64 = arith.extf %63 : vector<16x128xbf16> to vector<16x128xf32>
    %65 = vector.broadcast %61 : f32 to vector<16x128xf32>
    %66 = arith.mulf %65, %64 : vector<16x128xf32>
    %67 = arith.addf %60, %66 : vector<16x128xf32>
    %c3_48 = arith.constant 3 : index
    %c0_49 = arith.constant 0 : index
    %c0_50 = arith.constant 0 : index
    %68 = vector.load %arg1[%c3_48, %c0_49, %c0_50] : memref<4x16x16xbf16, #tpu.memory_space<vmem>>, vector<1x16x16xbf16>
    %69 = vector.shape_cast %68 : vector<1x16x16xbf16> to vector<16x16xbf16>
    %70 = arith.truncf %67 : vector<16x128xf32> to vector<16x128xbf16>
    %cst_51 = arith.constant dense<0.000000e+00> : vector<16x128xf32>
    %71 = tpu.matmul %69, %70, %cst_51 {dimension_numbers = #tpu.dot_dimension_numbers<[1], [0], [0], [1], [0, 0, 1, 1], [], []>} : vector<16x16xbf16>, vector<16x128xbf16>, vector<16x128xf32> -> vector<16x128xf32>
    %72 = arith.addf %54, %71 : vector<16x128xf32>
    %c0_52 = arith.constant 0 : index
    %c0_53 = arith.constant 0 : index
    %73 = vector.load %arg3[%c0_52, %c0_53] : memref<16x8xf32, #tpu.memory_space<vmem>>, vector<16x8xf32>
    %c0_54 = arith.constant 0 : index
    %c0_55 = arith.constant 0 : index
    %74 = vector.load %arg6[%c0_54, %c0_55] : memref<8x128xf32, #tpu.memory_space<vmem>>, vector<8x128xf32>
    %cst_56 = arith.constant dense<0.000000e+00> : vector<16x128xf32>
    %75 = tpu.matmul %73, %74, %cst_56 {dimension_numbers = #tpu.dot_dimension_numbers<[1], [0], [0], [1], [0, 0, 1, 1], [], []>} : vector<16x8xf32>, vector<8x128xf32>, vector<16x128xf32> -> vector<16x128xf32>
    %c0_57 = arith.constant 0 : index
    %c0_58 = arith.constant 0 : index
    %76 = vector.load %arg7[%c0_57, %c0_58] : memref<128x128xf32, #tpu.memory_space<vmem>>, vector<128x128xf32>
    %cst_59 = arith.constant dense<0.000000e+00> : vector<16x128xf32>
    %77 = tpu.matmul %72, %76, %cst_59 {dimension_numbers = #tpu.dot_dimension_numbers<[1], [0], [0], [1], [0, 0, 1, 1], [], []>} : vector<16x128xf32>, vector<128x128xf32>, vector<16x128xf32> -> vector<16x128xf32>
    %c0_60 = arith.constant 0 : index
    %c0_61 = arith.constant 0 : index
    %78 = vector.load %arg8[%c0_60, %c0_61] : memref<128x128xf32, #tpu.memory_space<vmem>>, vector<128x128xf32>
    %cst_62 = arith.constant dense<0.000000e+00> : vector<16x128xf32>
    %79 = tpu.matmul %75, %78, %cst_62 {dimension_numbers = #tpu.dot_dimension_numbers<[1], [0], [0], [1], [0, 0, 1, 1], [], []>} : vector<16x128xf32>, vector<128x128xf32>, vector<16x128xf32> -> vector<16x128xf32>
    %80 = arith.addf %77, %79 : vector<16x128xf32>
    %c0_63 = arith.constant 0 : index
    %c0_64 = arith.constant 0 : index
    %81 = vector.load %arg4[%c0_63, %c0_64] : memref<16x4xf32, #tpu.memory_space<vmem>>, vector<16x4xf32>
    %c0_65 = arith.constant 0 : index
    %c0_66 = arith.constant 0 : index
    %82 = vector.load %arg9[%c0_65, %c0_66] : memref<4x128xf32, #tpu.memory_space<vmem>>, vector<4x128xf32>
    %cst_67 = arith.constant dense<0.000000e+00> : vector<16x128xf32>
    %83 = tpu.matmul %81, %82, %cst_67 {dimension_numbers = #tpu.dot_dimension_numbers<[1], [0], [0], [1], [0, 0, 1, 1], [], []>} : vector<16x4xf32>, vector<4x128xf32>, vector<16x128xf32> -> vector<16x128xf32>
    %84 = arith.addf %80, %83 : vector<16x128xf32>
    %c0_68 = arith.constant 0 : index
    %c0_69 = arith.constant 0 : index
    %85 = vector.load %arg10[%c0_68, %c0_69] : memref<1x128xf32, #tpu.memory_space<vmem>>, vector<1x128xf32>
    %86 = vector.broadcast %85 : vector<1x128xf32> to vector<16x128xf32>
    %87 = arith.addf %84, %86 : vector<16x128xf32>
    %cst_70 = arith.constant 0.000000e+00 : f32
    %88 = vector.broadcast %cst_70 : f32 to vector<16x128xf32>
    %89 = arith.maximumf %87, %88 : vector<16x128xf32>
    %c0_71 = arith.constant 0 : index
    %c0_72 = arith.constant 0 : index
    %90 = vector.load %arg11[%c0_71, %c0_72] : memref<1x128xf32, #tpu.memory_space<vmem>>, vector<1x128xf32>
    %91 = vector.broadcast %90 : vector<1x128xf32> to vector<16x128xf32>
    %92 = arith.addf %89, %91 : vector<16x128xf32>
    %cst_73 = arith.constant 0.000000e+00 : f32
    %93 = vector.broadcast %cst_73 : f32 to vector<16x128xf32>
    %94 = arith.maximumf %92, %93 : vector<16x128xf32>
    %c0_74 = arith.constant 0 : index
    %c0_75 = arith.constant 0 : index
    %95 = vector.load %arg12[%c0_74, %c0_75] : memref<16x128xf32, #tpu.memory_space<vmem>>, vector<16x128xf32>
    tpu.vector_store %arg12[%c0_74, %c0_75], %94 {strides = array<i32>} : memref<16x128xf32, #tpu.memory_space<vmem>>, vector<16x128xf32>,
    return
  }
  func.func @transform_0(%arg0: i32) -> (i32, i32, i32) {
    %c0_i32 = arith.constant 0 : i32
    %c0_i32_0 = arith.constant 0 : i32
    %c0_i32_1 = arith.constant 0 : i32
    return %c0_i32, %arg0, %c0_i32_0 : i32, i32, i32
  }
  func.func @transform_1(%arg0: i32) -> (i32, i32, i32) {
    %c0_i32 = arith.constant 0 : i32
    %c0_i32_0 = arith.constant 0 : i32
    %c0_i32_1 = arith.constant 0 : i32
    %c0_i32_2 = arith.constant 0 : i32
    return %c0_i32, %c0_i32_0, %c0_i32_1 : i32, i32, i32
  }
  func.func @transform_2(%arg0: i32) -> (i32, i32) {
    %c0_i32 = arith.constant 0 : i32
    %c0_i32_0 = arith.constant 0 : i32
    return %arg0, %c0_i32 : i32, i32
  }
  func.func @transform_3(%arg0: i32) -> (i32, i32) {
    %c0_i32 = arith.constant 0 : i32
    %c0_i32_0 = arith.constant 0 : i32
    return %arg0, %c0_i32 : i32, i32
  }
  func.func @transform_4(%arg0: i32) -> (i32, i32) {
    %c0_i32 = arith.constant 0 : i32
    %c0_i32_0 = arith.constant 0 : i32
    %c0_i32_1 = arith.constant 0 : i32
    return %c0_i32, %c0_i32_0 : i32, i32
  }
  func.func @transform_5(%arg0: i32) -> (i32, i32) {
    %c0_i32 = arith.constant 0 : i32
    %c0_i32_0 = arith.constant 0 : i32
    %c0_i32_1 = arith.constant 0 : i32
    return %c0_i32, %c0_i32_0 : i32, i32
  }
  func.func @transform_6(%arg0: i32) -> (i32, i32) {
    %c0_i32 = arith.constant 0 : i32
    %c0_i32_0 = arith.constant 0 : i32
    %c0_i32_1 = arith.constant 0 : i32
    return %c0_i32, %c0_i32_0 : i32, i32
  }
  func.func @transform_7(%arg0: i32) -> (i32, i32) {
    %c0_i32 = arith.constant 0 : i32
    %c0_i32_0 = arith.constant 0 : i32
    %c0_i32_1 = arith.constant 0 : i32
    return %c0_i32, %c0_i32_0 : i32, i32
  }
  func.func @transform_8(%arg0: i32) -> (i32, i32) {
    %c0_i32 = arith.constant 0 : i32
    %c0_i32_0 = arith.constant 0 : i32
    %c0_i32_1 = arith.constant 0 : i32
    return %c0_i32, %c0_i32_0 : i32, i32
  }
  func.func @transform_9(%arg0: i32) -> (i32, i32) {
    %c0_i32 = arith.constant 0 : i32
    %c0_i32_0 = arith.constant 0 : i32
    %c0_i32_1 = arith.constant 0 : i32
    return %c0_i32, %c0_i32_0 : i32, i32
  }
  func.func @transform_10(%arg0: i32) -> (i32, i32) {
    %c0_i32 = arith.constant 0 : i32
    %c0_i32_0 = arith.constant 0 : i32
    %c0_i32_1 = arith.constant 0 : i32
    return %c0_i32, %c0_i32_0 : i32, i32
  }
  func.func @transform_11(%arg0: i32) -> (i32, i32) {
    %c0_i32 = arith.constant 0 : i32
    %c0_i32_0 = arith.constant 0 : i32
    return %arg0, %c0_i32 : i32, i32
  }
}

module attributes {stable_mosaic.version = 11 : i64} {
  func.func @rgcn_layer_kernel(%arg0: i32, %arg1: memref<4x16x16xbf16, #tpu.memory_space<vmem>>, %arg2: memref<2x16x128xbf16, #tpu.memory_space<vmem>>, %arg3: memref<16x128xf32, #tpu.memory_space<vmem>>, %arg4: memref<16x4xf32, #tpu.memory_space<vmem>>, %arg5: memref<4x2xf32, #tpu.memory_space<smem>>, %arg6: memref<128x128xf32, #tpu.memory_space<vmem>>, %arg7: memref<128x128xf32, #tpu.memory_space<vmem>>, %arg8: memref<128x128xf32, #tpu.memory_space<vmem>>, %arg9: memref<4x128xf32, #tpu.memory_space<vmem>>, %arg10: memref<1x128xf32, #tpu.memory_space<vmem>>, %arg11: memref<1x128xf32, #tpu.memory_space<vmem>>, %arg12: memref<16x128xf32, #tpu.memory_space<vmem>>) attributes {dimension_semantics = [#tpu.dimension_semantics<parallel>], iteration_bounds = array<i64: 1>, scalar_prefetch = 0 : i64, scratch_operands = 0 : i64, tpu.core_type = #tpu.core_type<tc>, window_params = [{transform_indices = @transform_0, window_bounds = array<i64: 4, 16, 16>}, {pipeline_mode = #tpu.pipeline_mode<synchronous>, transform_indices = @transform_1, window_bounds = array<i64: 2, 16, 128>}, {transform_indices = @transform_2, window_bounds = array<i64: 16, 128>}, {transform_indices = @transform_3, window_bounds = array<i64: 16, 4>}, {transform_indices = @transform_4, window_bounds = array<i64: 4, 2>}, {pipeline_mode = #tpu.pipeline_mode<synchronous>, transform_indices = @transform_5, window_bounds = array<i64: 128, 128>}, {pipeline_mode = #tpu.pipeline_mode<synchronous>, transform_indices = @transform_6, window_bounds = array<i64: 128, 128>}, {pipeline_mode = #tpu.pipeline_mode<synchronous>, transform_indices = @transform_7, window_bounds = array<i64: 128, 128>}, {pipeline_mode = #tpu.pipeline_mode<synchronous>, transform_indices = @transform_8, window_bounds = array<i64: 4, 128>}, {pipeline_mode = #tpu.pipeline_mode<synchronous>, transform_indices = @transform_9, window_bounds = array<i64: 1, 128>}, {pipeline_mode = #tpu.pipeline_mode<synchronous>, transform_indices = @transform_10, window_bounds = array<i64: 1, 128>}, {transform_indices = @transform_11, window_bounds = array<i64: 16, 128>}]} {
    %cst = arith.constant 0.000000e+00 : f32
    %0 = vector.broadcast %cst : f32 to vector<16x128xf32>
    %c0 = arith.constant 0 : index
    %c0_0 = arith.constant 0 : index
    %1 = memref.load %arg5[%c0, %c0_0] : memref<4x2xf32, #tpu.memory_space<smem>>
    %c0_1 = arith.constant 0 : index
    %c0_2 = arith.constant 0 : index
    %c0_3 = arith.constant 0 : index
    %2 = vector.load %arg2[%c0_1, %c0_2, %c0_3] : memref<2x16x128xbf16, #tpu.memory_space<vmem>>, vector<1x16x128xbf16>
    %3 = vector.shape_cast %2 : vector<1x16x128xbf16> to vector<16x128xbf16>
    %4 = arith.extf %3 : vector<16x128xbf16> to vector<16x128xf32>
    %5 = vector.broadcast %1 : f32 to vector<16x128xf32>
    %6 = arith.mulf %5, %4 : vector<16x128xf32>
    %c0_4 = arith.constant 0 : index
    %c1 = arith.constant 1 : index
    %7 = memref.load %arg5[%c0_4, %c1] : memref<4x2xf32, #tpu.memory_space<smem>>
    %c1_5 = arith.constant 1 : index
    %c0_6 = arith.constant 0 : index
    %c0_7 = arith.constant 0 : index
    %8 = vector.load %arg2[%c1_5, %c0_6, %c0_7] : memref<2x16x128xbf16, #tpu.memory_space<vmem>>, vector<1x16x128xbf16>
    %9 = vector.shape_cast %8 : vector<1x16x128xbf16> to vector<16x128xbf16>
    %10 = arith.extf %9 : vector<16x128xbf16> to vector<16x128xf32>
    %11 = vector.broadcast %7 : f32 to vector<16x128xf32>
    %12 = arith.mulf %11, %10 : vector<16x128xf32>
    %13 = arith.addf %6, %12 : vector<16x128xf32>
    %c0_8 = arith.constant 0 : index
    %c0_9 = arith.constant 0 : index
    %c0_10 = arith.constant 0 : index
    %14 = vector.load %arg1[%c0_8, %c0_9, %c0_10] : memref<4x16x16xbf16, #tpu.memory_space<vmem>>, vector<1x16x16xbf16>
    %15 = vector.shape_cast %14 : vector<1x16x16xbf16> to vector<16x16xbf16>
    %16 = arith.truncf %13 : vector<16x128xf32> to vector<16x128xbf16>
    %cst_11 = arith.constant dense<0.000000e+00> : vector<16x128xf32>
    %17 = tpu.matmul %15, %16, %cst_11 {dimension_numbers = #tpu.dot_dimension_numbers<[1], [0], [0], [1], [0, 0, 1, 1], [], []>} : vector<16x16xbf16>, vector<16x128xbf16>, vector<16x128xf32> -> vector<16x128xf32>
    %18 = arith.addf %0, %17 : vector<16x128xf32>
    %c1_12 = arith.constant 1 : index
    %c0_13 = arith.constant 0 : index
    %19 = memref.load %arg5[%c1_12, %c0_13] : memref<4x2xf32, #tpu.memory_space<smem>>
    %c0_14 = arith.constant 0 : index
    %c0_15 = arith.constant 0 : index
    %c0_16 = arith.constant 0 : index
    %20 = vector.load %arg2[%c0_14, %c0_15, %c0_16] : memref<2x16x128xbf16, #tpu.memory_space<vmem>>, vector<1x16x128xbf16>
    %21 = vector.shape_cast %20 : vector<1x16x128xbf16> to vector<16x128xbf16>
    %22 = arith.extf %21 : vector<16x128xbf16> to vector<16x128xf32>
    %23 = vector.broadcast %19 : f32 to vector<16x128xf32>
    %24 = arith.mulf %23, %22 : vector<16x128xf32>
    %c1_17 = arith.constant 1 : index
    %c1_18 = arith.constant 1 : index
    %25 = memref.load %arg5[%c1_17, %c1_18] : memref<4x2xf32, #tpu.memory_space<smem>>
    %c1_19 = arith.constant 1 : index
    %c0_20 = arith.constant 0 : index
    %c0_21 = arith.constant 0 : index
    %26 = vector.load %arg2[%c1_19, %c0_20, %c0_21] : memref<2x16x128xbf16, #tpu.memory_space<vmem>>, vector<1x16x128xbf16>
    %27 = vector.shape_cast %26 : vector<1x16x128xbf16> to vector<16x128xbf16>
    %28 = arith.extf %27 : vector<16x128xbf16> to vector<16x128xf32>
    %29 = vector.broadcast %25 : f32 to vector<16x128xf32>
    %30 = arith.mulf %29, %28 : vector<16x128xf32>
    %31 = arith.addf %24, %30 : vector<16x128xf32>
    %c1_22 = arith.constant 1 : index
    %c0_23 = arith.constant 0 : index
    %c0_24 = arith.constant 0 : index
    %32 = vector.load %arg1[%c1_22, %c0_23, %c0_24] : memref<4x16x16xbf16, #tpu.memory_space<vmem>>, vector<1x16x16xbf16>
    %33 = vector.shape_cast %32 : vector<1x16x16xbf16> to vector<16x16xbf16>
    %34 = arith.truncf %31 : vector<16x128xf32> to vector<16x128xbf16>
    %cst_25 = arith.constant dense<0.000000e+00> : vector<16x128xf32>
    %35 = tpu.matmul %33, %34, %cst_25 {dimension_numbers = #tpu.dot_dimension_numbers<[1], [0], [0], [1], [0, 0, 1, 1], [], []>} : vector<16x16xbf16>, vector<16x128xbf16>, vector<16x128xf32> -> vector<16x128xf32>
    %36 = arith.addf %18, %35 : vector<16x128xf32>
    %c2 = arith.constant 2 : index
    %c0_26 = arith.constant 0 : index
    %37 = memref.load %arg5[%c2, %c0_26] : memref<4x2xf32, #tpu.memory_space<smem>>
    %c0_27 = arith.constant 0 : index
    %c0_28 = arith.constant 0 : index
    %c0_29 = arith.constant 0 : index
    %38 = vector.load %arg2[%c0_27, %c0_28, %c0_29] : memref<2x16x128xbf16, #tpu.memory_space<vmem>>, vector<1x16x128xbf16>
    %39 = vector.shape_cast %38 : vector<1x16x128xbf16> to vector<16x128xbf16>
    %40 = arith.extf %39 : vector<16x128xbf16> to vector<16x128xf32>
    %41 = vector.broadcast %37 : f32 to vector<16x128xf32>
    %42 = arith.mulf %41, %40 : vector<16x128xf32>
    %c2_30 = arith.constant 2 : index
    %c1_31 = arith.constant 1 : index
    %43 = memref.load %arg5[%c2_30, %c1_31] : memref<4x2xf32, #tpu.memory_space<smem>>
    %c1_32 = arith.constant 1 : index
    %c0_33 = arith.constant 0 : index
    %c0_34 = arith.constant 0 : index
    %44 = vector.load %arg2[%c1_32, %c0_33, %c0_34] : memref<2x16x128xbf16, #tpu.memory_space<vmem>>, vector<1x16x128xbf16>
    %45 = vector.shape_cast %44 : vector<1x16x128xbf16> to vector<16x128xbf16>
    %46 = arith.extf %45 : vector<16x128xbf16> to vector<16x128xf32>
    %47 = vector.broadcast %43 : f32 to vector<16x128xf32>
    %48 = arith.mulf %47, %46 : vector<16x128xf32>
    %49 = arith.addf %42, %48 : vector<16x128xf32>
    %c2_35 = arith.constant 2 : index
    %c0_36 = arith.constant 0 : index
    %c0_37 = arith.constant 0 : index
    %50 = vector.load %arg1[%c2_35, %c0_36, %c0_37] : memref<4x16x16xbf16, #tpu.memory_space<vmem>>, vector<1x16x16xbf16>
    %51 = vector.shape_cast %50 : vector<1x16x16xbf16> to vector<16x16xbf16>
    %52 = arith.truncf %49 : vector<16x128xf32> to vector<16x128xbf16>
    %cst_38 = arith.constant dense<0.000000e+00> : vector<16x128xf32>
    %53 = tpu.matmul %51, %52, %cst_38 {dimension_numbers = #tpu.dot_dimension_numbers<[1], [0], [0], [1], [0, 0, 1, 1], [], []>} : vector<16x16xbf16>, vector<16x128xbf16>, vector<16x128xf32> -> vector<16x128xf32>
    %54 = arith.addf %36, %53 : vector<16x128xf32>
    %c3 = arith.constant 3 : index
    %c0_39 = arith.constant 0 : index
    %55 = memref.load %arg5[%c3, %c0_39] : memref<4x2xf32, #tpu.memory_space<smem>>
    %c0_40 = arith.constant 0 : index
    %c0_41 = arith.constant 0 : index
    %c0_42 = arith.constant 0 : index
    %56 = vector.load %arg2[%c0_40, %c0_41, %c0_42] : memref<2x16x128xbf16, #tpu.memory_space<vmem>>, vector<1x16x128xbf16>
    %57 = vector.shape_cast %56 : vector<1x16x128xbf16> to vector<16x128xbf16>
    %58 = arith.extf %57 : vector<16x128xbf16> to vector<16x128xf32>
    %59 = vector.broadcast %55 : f32 to vector<16x128xf32>
    %60 = arith.mulf %59, %58 : vector<16x128xf32>
    %c3_43 = arith.constant 3 : index
    %c1_44 = arith.constant 1 : index
    %61 = memref.load %arg5[%c3_43, %c1_44] : memref<4x2xf32, #tpu.memory_space<smem>>
    %c1_45 = arith.constant 1 : index
    %c0_46 = arith.constant 0 : index
    %c0_47 = arith.constant 0 : index
    %62 = vector.load %arg2[%c1_45, %c0_46, %c0_47] : memref<2x16x128xbf16, #tpu.memory_space<vmem>>, vector<1x16x128xbf16>
    %63 = vector.shape_cast %62 : vector<1x16x128xbf16> to vector<16x128xbf16>
    %64 = arith.extf %63 : vector<16x128xbf16> to vector<16x128xf32>
    %65 = vector.broadcast %61 : f32 to vector<16x128xf32>
    %66 = arith.mulf %65, %64 : vector<16x128xf32>
    %67 = arith.addf %60, %66 : vector<16x128xf32>
    %c3_48 = arith.constant 3 : index
    %c0_49 = arith.constant 0 : index
    %c0_50 = arith.constant 0 : index
    %68 = vector.load %arg1[%c3_48, %c0_49, %c0_50] : memref<4x16x16xbf16, #tpu.memory_space<vmem>>, vector<1x16x16xbf16>
    %69 = vector.shape_cast %68 : vector<1x16x16xbf16> to vector<16x16xbf16>
    %70 = arith.truncf %67 : vector<16x128xf32> to vector<16x128xbf16>
    %cst_51 = arith.constant dense<0.000000e+00> : vector<16x128xf32>
    %71 = tpu.matmul %69, %70, %cst_51 {dimension_numbers = #tpu.dot_dimension_numbers<[1], [0], [0], [1], [0, 0, 1, 1], [], []>} : vector<16x16xbf16>, vector<16x128xbf16>, vector<16x128xf32> -> vector<16x128xf32>
    %72 = arith.addf %54, %71 : vector<16x128xf32>
    %c0_52 = arith.constant 0 : index
    %c0_53 = arith.constant 0 : index
    %73 = vector.load %arg3[%c0_52, %c0_53] : memref<16x128xf32, #tpu.memory_space<vmem>>, vector<16x128xf32>
    %c0_54 = arith.constant 0 : index
    %c0_55 = arith.constant 0 : index
    %74 = vector.load %arg6[%c0_54, %c0_55] : memref<128x128xf32, #tpu.memory_space<vmem>>, vector<128x128xf32>
    %cst_56 = arith.constant dense<0.000000e+00> : vector<16x128xf32>
    %75 = tpu.matmul %73, %74, %cst_56 {dimension_numbers = #tpu.dot_dimension_numbers<[1], [0], [0], [1], [0, 0, 1, 1], [], []>} : vector<16x128xf32>, vector<128x128xf32>, vector<16x128xf32> -> vector<16x128xf32>
    %c0_57 = arith.constant 0 : index
    %c0_58 = arith.constant 0 : index
    %76 = vector.load %arg7[%c0_57, %c0_58] : memref<128x128xf32, #tpu.memory_space<vmem>>, vector<128x128xf32>
    %cst_59 = arith.constant dense<0.000000e+00> : vector<16x128xf32>
    %77 = tpu.matmul %72, %76, %cst_59 {dimension_numbers = #tpu.dot_dimension_numbers<[1], [0], [0], [1], [0, 0, 1, 1], [], []>} : vector<16x128xf32>, vector<128x128xf32>, vector<16x128xf32> -> vector<16x128xf32>
    %c0_60 = arith.constant 0 : index
    %c0_61 = arith.constant 0 : index
    %78 = vector.load %arg8[%c0_60, %c0_61] : memref<128x128xf32, #tpu.memory_space<vmem>>, vector<128x128xf32>
    %cst_62 = arith.constant dense<0.000000e+00> : vector<16x128xf32>
    %79 = tpu.matmul %75, %78, %cst_62 {dimension_numbers = #tpu.dot_dimension_numbers<[1], [0], [0], [1], [0, 0, 1, 1], [], []>} : vector<16x128xf32>, vector<128x128xf32>, vector<16x128xf32> -> vector<16x128xf32>
    %80 = arith.addf %77, %79 : vector<16x128xf32>
    %c0_63 = arith.constant 0 : index
    %c0_64 = arith.constant 0 : index
    %81 = vector.load %arg4[%c0_63, %c0_64] : memref<16x4xf32, #tpu.memory_space<vmem>>, vector<16x4xf32>
    %c0_65 = arith.constant 0 : index
    %c0_66 = arith.constant 0 : index
    %82 = vector.load %arg9[%c0_65, %c0_66] : memref<4x128xf32, #tpu.memory_space<vmem>>, vector<4x128xf32>
    %cst_67 = arith.constant dense<0.000000e+00> : vector<16x128xf32>
    %83 = tpu.matmul %81, %82, %cst_67 {dimension_numbers = #tpu.dot_dimension_numbers<[1], [0], [0], [1], [0, 0, 1, 1], [], []>} : vector<16x4xf32>, vector<4x128xf32>, vector<16x128xf32> -> vector<16x128xf32>
    %84 = arith.addf %80, %83 : vector<16x128xf32>
    %c0_68 = arith.constant 0 : index
    %c0_69 = arith.constant 0 : index
    %85 = vector.load %arg10[%c0_68, %c0_69] : memref<1x128xf32, #tpu.memory_space<vmem>>, vector<1x128xf32>
    %86 = vector.broadcast %85 : vector<1x128xf32> to vector<16x128xf32>
    %87 = arith.addf %84, %86 : vector<16x128xf32>
    %cst_70 = arith.constant 0.000000e+00 : f32
    %88 = vector.broadcast %cst_70 : f32 to vector<16x128xf32>
    %89 = arith.maximumf %87, %88 : vector<16x128xf32>
    %c0_71 = arith.constant 0 : index
    %c0_72 = arith.constant 0 : index
    %90 = vector.load %arg11[%c0_71, %c0_72] : memref<1x128xf32, #tpu.memory_space<vmem>>, vector<1x128xf32>
    %91 = vector.broadcast %90 : vector<1x128xf32> to vector<16x128xf32>
    %92 = arith.addf %89, %91 : vector<16x128xf32>
    %cst_73 = arith.constant 0.000000e+00 : f32
    %93 = vector.broadcast %cst_73 : f32 to vector<16x128xf32>
    %94 = arith.maximumf %92, %93 : vector<16x128xf32>
    %c0_74 = arith.constant 0 : index
    %c0_75 = arith.constant 0 : index
    %95 = vector.load %arg12[%c0_74, %c0_75] : memref<16x128xf32, #tpu.memory_space<vmem>>, vector<16x128xf32>
    tpu.vector_store %arg12[%c0_74, %c0_75], %94 {strides = array<i32>} : memref<16x128xf32, #tpu.memory_space<vmem>>, vector<16x128xf32>,
    return
  }
  func.func @transform_0(%arg0: i32) -> (i32, i32, i32) {
    %c0_i32 = arith.constant 0 : i32
    %c0_i32_0 = arith.constant 0 : i32
    %c0_i32_1 = arith.constant 0 : i32
    return %c0_i32, %arg0, %c0_i32_0 : i32, i32, i32
  }
  func.func @transform_1(%arg0: i32) -> (i32, i32, i32) {
    %c0_i32 = arith.constant 0 : i32
    %c0_i32_0 = arith.constant 0 : i32
    %c0_i32_1 = arith.constant 0 : i32
    %c0_i32_2 = arith.constant 0 : i32
    return %c0_i32, %c0_i32_0, %c0_i32_1 : i32, i32, i32
  }
  func.func @transform_2(%arg0: i32) -> (i32, i32) {
    %c0_i32 = arith.constant 0 : i32
    %c0_i32_0 = arith.constant 0 : i32
    return %arg0, %c0_i32 : i32, i32
  }
  func.func @transform_3(%arg0: i32) -> (i32, i32) {
    %c0_i32 = arith.constant 0 : i32
    %c0_i32_0 = arith.constant 0 : i32
    return %arg0, %c0_i32 : i32, i32
  }
  func.func @transform_4(%arg0: i32) -> (i32, i32) {
    %c0_i32 = arith.constant 0 : i32
    %c0_i32_0 = arith.constant 0 : i32
    %c0_i32_1 = arith.constant 0 : i32
    return %c0_i32, %c0_i32_0 : i32, i32
  }
  func.func @transform_5(%arg0: i32) -> (i32, i32) {
    %c0_i32 = arith.constant 0 : i32
    %c0_i32_0 = arith.constant 0 : i32
    %c0_i32_1 = arith.constant 0 : i32
    return %c0_i32, %c0_i32_0 : i32, i32
  }
  func.func @transform_6(%arg0: i32) -> (i32, i32) {
    %c0_i32 = arith.constant 0 : i32
    %c0_i32_0 = arith.constant 0 : i32
    %c0_i32_1 = arith.constant 0 : i32
    return %c0_i32, %c0_i32_0 : i32, i32
  }
  func.func @transform_7(%arg0: i32) -> (i32, i32) {
    %c0_i32 = arith.constant 0 : i32
    %c0_i32_0 = arith.constant 0 : i32
    %c0_i32_1 = arith.constant 0 : i32
    return %c0_i32, %c0_i32_0 : i32, i32
  }
  func.func @transform_8(%arg0: i32) -> (i32, i32) {
    %c0_i32 = arith.constant 0 : i32
    %c0_i32_0 = arith.constant 0 : i32
    %c0_i32_1 = arith.constant 0 : i32
    return %c0_i32, %c0_i32_0 : i32, i32
  }
  func.func @transform_9(%arg0: i32) -> (i32, i32) {
    %c0_i32 = arith.constant 0 : i32
    %c0_i32_0 = arith.constant 0 : i32
    %c0_i32_1 = arith.constant 0 : i32
    return %c0_i32, %c0_i32_0 : i32, i32
  }
  func.func @transform_10(%arg0: i32) -> (i32, i32) {
    %c0_i32 = arith.constant 0 : i32
    %c0_i32_0 = arith.constant 0 : i32
    %c0_i32_1 = arith.constant 0 : i32
    return %c0_i32, %c0_i32_0 : i32, i32
  }
  func.func @transform_11(%arg0: i32) -> (i32, i32) {
    %c0_i32 = arith.constant 0 : i32
    %c0_i32_0 = arith.constant 0 : i32
    return %arg0, %c0_i32 : i32, i32
  }
}

</mosaic_0001>

<bundles_post_ra>
// kernel: rgcn_2_forward.2
= control target key start
LH: loop header
LB: loop body
LE: loop exit
PB: predicated region body
PF: predicated region fallthrough
CT: control target
= control target key end

     0   :  { %16 = vsyncpa [#allocation3], 0  ;;  %s452_s20 = smov [#allocation2]   ;;  %s670_s0 = inlined_call_operand.vmem [shape: bf16[4,16,16], index: 0, kind: input, shape index: {}]   ;;  %s671_s1 = inlined_call_operand.vmem [shape: bf16[2,16,128], index: 1, kind: input, shape index: {}]   ;;  %s672_s2 = inlined_call_operand.vmem [shape: f32[16,8], index: 2, kind: input, shape index: {}]   ;;  %s673_s3 = inlined_call_operand.vmem [shape: f32[16,4], index: 3, kind: input, shape index: {}]   ;;  %s674_s4 = inlined_call_operand.vmem [shape: f32[4,2], index: 4, kind: input, shape index: {}]   ;;  %s675_s5 = inlined_call_operand.vmem [shape: f32[8,128], index: 5, kind: input, shape index: {}]   ;;  %s676_s6 = inlined_call_operand.vmem [shape: f32[128,128], index: 6, kind: input, shape index: {}]   ;;  %s677_s7 = inlined_call_operand.vmem [shape: f32[128,128], index: 7, kind: input, shape index: {}]   ;;  %s678_s8 = inlined_call_operand.vmem [shape: f32[4,128], index: 8, kind: input, shape index: {}]   ;;  %s679_s9 = inlined_call_operand.vmem [shape: f32[1,128], index: 9, kind: input, shape index: {}]   ;;  %s680_s10 = inlined_call_operand.vmem [shape: f32[1,128], index: 10, kind: input, shape index: {}]   ;;  %s681_s11 = inlined_call_operand.vmem [shape: f32[16,128], index: 11, kind: output, shape index: {}]  }
   0x1   :  { %s30_s19 = sshll.u32 %s674_s4, 4  ;;  %s31_s19 = int_to_ptr.vmem [resolvable:$true] %s30_s19 }
   0x2   :  { %33 = dma.vmem_to_smem %s31_s19, 64, %s452_s20, [#allocation3]  }
   0x3   :  { %450 = dma.done.wait [#allocation3], 64  }
   0x4   :  { %451 = vsyncadd [#allocation3], 4294967232 }
   0x5   :  { %50 = sfence }
   0x6   :  { %v427_v0 = vld [vmem:[%s671_s1] sm:$0xff]   ;;  %s385_s23 = sld [smem:[#allocation2 + $0x80]]  ;;  %v434_v1 = vld [vmem:[%s671_s1 + $0x8] sm:$0xff]   ;;  %vm93_vm0 = vcmask 130048   ;;  %v273_v36 = vld [vmem:[%s677_s7 + $0x78] sm:$0xff]  ;;  %vm330_vm1 = vcmask 1043456  }
   0x7   :  { %s386_s26 = sld [smem:[#allocation2 + $0x81]]  ;;  %v428_v2 = vunpack.c.l.bf16 %v427_v0  ;;  %v429_v3 = vunpack.c.h.bf16 %v427_v0  ;;  %v432_v4 = vunpack.c.l.bf16 %v434_v1  ;;  %v433_v5 = vunpack.c.h.bf16 %v434_v1  ;;  %v211_v26 = vld [vmem:[%s675_s5] sm:$0xff]  ;;  %v423_v31 = vld [vmem:[%s670_s0 + $0x8] sm:$0xff]  ;;  %v257_v45 = vld [vmem:[%s676_s6 + $0x78] sm:$0xff] }
   0x8   :  { %s52_s27 = sld [smem:[#allocation2]]  ;;  %v422_v41 = vld [vmem:[%s670_s0] sm:$0xff]  ;;  %v272_v46 = vld [vmem:[%s677_s7 + $0x70] sm:$0xff]  ;;  %v271_v49 = vld [vmem:[%s677_s7 + $0x68] sm:$0xff]  ;;  %vm212_vm2 = vcmask 64512   ;;  %vm323_vm3 = vcmask 31744  }
   0x9   :  { %s382_s4 = sld [smem:[#allocation2 + $0x1]]  ;;  %v424_v47 = vld [vmem:[%s670_s0 + $0x10] sm:$0xff]  ;;  %v425_v50 = vld [vmem:[%s670_s0 + $0x18] sm:$0xff]  ;;  %v322_v52 = vld [vmem:[%s678_s8] sm:$0xf] }
   0xa   :  { %s399_s28 = sld [smem:[#allocation2 + $0x100]]  ;;  %v256_v51 = vld [vmem:[%s676_s6 + $0x70] sm:$0xff]  ;;  %v270_v53 = vld [vmem:[%s677_s7 + $0x60] sm:$0xff]  ;;  %v255_v54 = vld [vmem:[%s676_s6 + $0x68] sm:$0xff] }
   0xb   :  { %s400_s29 = sld [smem:[#allocation2 + $0x101]]  ;;  %v269_v55 = vld [vmem:[%s677_s7 + $0x58] sm:$0xff]  ;;  %v254_v56 = vld [vmem:[%s676_s6 + $0x60] sm:$0xff]  ;;  %v268_v57 = vld [vmem:[%s677_s7 + $0x50] sm:$0xff] }
   0xc   :  { %v75_v6 = vstv %s385_s23  ;;  %s522_s30 = sld [smem:[#allocation2 + $0x180]]  ;;  %v253_v58 = vld [vmem:[%s676_s6 + $0x58] sm:$0xff]  ;;  %v267_v59 = vld [vmem:[%s677_s7 + $0x48] sm:$0xff]  ;;  %v252_v60 = vld [vmem:[%s676_s6 + $0x50] sm:$0xff] }
   0xd   :  { %v76_v7 = vmul.f32 %v428_v2, %v75_v6  ;;  %v77_v8 = vmul.f32 %v429_v3, %v75_v6  ;;  %v79_v9 = vstv %s386_s26  ;;  %s524_s12 = sld [smem:[#allocation2 + $0x181]]  ;;  %v209_v61 = vld [vmem:[%s672_s2] sm:$0xff]  ;;  %v251_v62 = vld [vmem:[%s676_s6 + $0x48] sm:$0xff]  ;;  %v249_v0 = vld [vmem:[%s676_s6 + $0x38] sm:$0xff] }
   0xe   :  { %v80_v10 = vmul.f32 %v432_v4, %v79_v9  ;;  %v81_v11 = vmul.f32 %v433_v5, %v79_v9  ;;  %v57_v12 = vstv %s52_s27  ;;  %v250_v63 = vld [vmem:[%s676_s6 + $0x40] sm:$0xff]  ;;  %v248_v1 = vld [vmem:[%s676_s6 + $0x30] sm:$0xff]  ;;  %v263_v9 = vld [vmem:[%s677_s7 + $0x28] sm:$0xff] }
   0xf   :  { %v58_v13 = vmul.f32 %v428_v2, %v57_v12  ;;  %v59_v14 = vmul.f32 %v429_v3, %v57_v12  ;;  %v66_v15 = vstv %s382_s4  ;;  %v246_v6 = vld [vmem:[%s676_s6 + $0x20] sm:$0xff]  ;;  %v243_v12 = vld [vmem:[%s676_s6 + $0x8] sm:$0xff] }
  0x10   :  { %v82_v16 = vadd.f32 %v80_v10, %v76_v7  ;;  %v83_v17 = vadd.f32 %v81_v11, %v77_v8  ;;  %v67_v18 = vmul.f32 %v432_v4, %v66_v15  ;;  %v68_v19 = vmul.f32 %v433_v5, %v66_v15  ;;  %v264_v7 = vld [vmem:[%s677_s7 + $0x30] sm:$0xff]  ;;  %v245_v8 = vld [vmem:[%s676_s6 + $0x18] sm:$0xff]  ;;  %v262_v11 = vld [vmem:[%s677_s7 + $0x20] sm:$0xff] }
  0x11   :  { %v134_v20 = vstv %s399_s28  ;;  %v138_v21 = vstv %s400_s29  ;;  %v244_v10 = vld [vmem:[%s676_s6 + $0x10] sm:$0xff] }
  0x12   :  { %v87_v22 = vpack.c.bf16 %v83_v17, %v82_v16  ;;  %v69_v23 = vadd.f32 %v67_v18, %v58_v13  ;;  %v70_v24 = vadd.f32 %v68_v19, %v59_v14  ;;  %v135_v25 = vmul.f32 %v428_v2, %v134_v20  ;;  %v261_v13 = vld [vmem:[%s677_s7 + $0x18] sm:$0xff]  ;;  %v242_v14 = vld [vmem:[%s676_s6] sm:$0xff]  ;;  %v260_v15 = vld [vmem:[%s677_s7 + $0x10] sm:$0xff] }
  0x13   :  { %v136_v27 = vmul.f32 %v429_v3, %v134_v20  ;;  %v139_v28 = vmul.f32 %v432_v4, %v138_v21  ;;  %v140_v29 = vmul.f32 %v433_v5, %v138_v21  ;;  %v172_v30 = vstv %s522_s30  ;;  %v320_v16 = vld [vmem:[%s673_s3] sm:$0xff]  ;;  %v259_v17 = vld [vmem:[%s677_s7 + $0x8] sm:$0xff] }
  0x14   :  { %104 = vmatpush.bf16.msra.mxu0 %v87_v22  ;;  %v73_v32 = vpack.c.bf16 %v70_v24, %v69_v23  ;;  %v173_v33 = vmul.f32 %v428_v2, %v172_v30  ;;  %v174_v34 = vmul.f32 %v429_v3, %v172_v30  ;;  %v176_v35 = vstv %s524_s12  ;;  %v210_v2 = vld [vmem:[%s672_s2 + $0x8] sm:$0xff]  ;;  %v266_v3 = vld [vmem:[%s677_s7 + $0x40] sm:$0xff] }
  0x15   :  { %v141_v37 = vadd.f32 %v139_v28, %v135_v25  ;;  %v142_v38 = vadd.f32 %v140_v29, %v136_v27  ;;  %v177_v39 = vmul.f32 %v432_v4, %v176_v35  ;;  %v178_v40 = vmul.f32 %v433_v5, %v176_v35  ;;  %v247_v4 = vld [vmem:[%s676_s6 + $0x28] sm:$0xff]  ;;  %v265_v5 = vld [vmem:[%s677_s7 + $0x38] sm:$0xff]  ;;  %v258_v18 = vld [vmem:[%s677_s7] sm:$0xff] }
  0x16   :  { %126 = vmatpush.bf16.msra.mxu1 %v73_v32  ;;  %v321_v19 = vld [vmem:[%s673_s3 + $0x8] sm:$0xff] }
  0x17   :  { %v146_v42 = vpack.c.bf16 %v142_v38, %v141_v37  ;;  %v179_v43 = vadd.f32 %v177_v39, %v173_v33  ;;  %v180_v44 = vadd.f32 %v178_v40, %v174_v34  ;;  %393 = vmatmul.msk.bf16.vlgmr.msra.gmra.mxu0 %vm93_vm0, %v423_v31  ;;  %v436_v40 = vld [vmem:[%s679_s9] ss:$0 sm:$0xff] }
  0x18   :  { %234 = vmatpush.msrb.mxu0 %v211_v26 }
  0x19   :  { %162 = vmatpush.bf16.msra.mxu2 %v146_v42  ;;  %v184_v48 = vpack.c.bf16 %v180_v44, %v179_v43  ;;  %398 = vmatmul.msk.bf16.vlgmr.msra.gmra.mxu1 %vm93_vm0, %v422_v41  ;;  %v437_v43 = vld [vmem:[%s680_s10] ss:$0 sm:$0xff] }
  0x1a   :  { %274 = vmatpush.msrb.mxu1 %v273_v36 }
  0x1b   :  { %200 = vmatpush.bf16.msra.mxu3 %v184_v48 }
  0x1c   :  { %275 = vmatpush.msrb.mxu1 %v272_v46  ;;  %407 = vmatmul.msk.bf16.vlgmr.msra.gmra.mxu2 %vm93_vm0, %v424_v47 }
  0x1d   :  { %297 = vmatpush.msrb.mxu2 %v257_v45 }
  0x1e   :  { %276 = vmatpush.msrb.mxu1 %v271_v49  ;;  %416 = vmatmul.msk.bf16.vlgmr.msra.gmra.mxu3 %vm93_vm0, %v425_v50 }
  0x1f   :  { %298 = vmatpush.msrb.mxu2 %v256_v51  ;;  %419 = vmatpush.msk.msrb.mxu3 %vm330_vm1, %v322_v52 }
  0x20   :  { %277 = vmatpush.msrb.mxu1 %v270_v53 }
  0x21   :  { %299 = vmatpush.msrb.mxu2 %v255_v54 }
  0x22   :  { %278 = vmatpush.msrb.mxu1 %v269_v55 }
  0x23   :  { %300 = vmatpush.msrb.mxu2 %v254_v56 }
  0x24   :  { %279 = vmatpush.msrb.mxu1 %v268_v57 }
  0x25   :  { %301 = vmatpush.msrb.mxu2 %v253_v58 }
  0x26   :  { %280 = vmatpush.msrb.mxu1 %v267_v59 }
  0x27   :  { %302 = vmatpush.msrb.mxu2 %v252_v60  ;;  %417 = vmatmul.msk.f32.vlgmr.msrb.gmra.mxu0 %vm212_vm2, %v209_v61 }
  0x28   :  { %281 = vmatpush.msrb.mxu1 %v266_v3 }
  0x29   :  { %303 = vmatpush.msrb.mxu2 %v251_v62 }
  0x2a   :  { %282 = vmatpush.msrb.mxu1 %v265_v5 }
  0x2b   :  { %304 = vmatpush.msrb.mxu2 %v250_v63 }
  0x2c   :  { %283 = vmatpush.msrb.mxu1 %v264_v7 }
  0x2d   :  { %305 = vmatpush.msrb.mxu2 %v249_v0 }
  0x2e   :  { %284 = vmatpush.msrb.mxu1 %v263_v9  ;;  %420 = vmatmul.msk.f32.vlgmr.msrb.gmra.mxu3 %vm323_vm3, %v320_v16 }
  0x2f   :  { %306 = vmatpush.msrb.mxu2 %v248_v1  ;;  %418 = vmatmul.msk.f32.gmra.mxu0 %vm212_vm2, %v210_v2 }
  0x30   :  { %285 = vmatpush.msrb.mxu1 %v262_v11 }
  0x31   :  { %307 = vmatpush.msrb.mxu2 %v247_v4 }
  0x32   :  { %286 = vmatpush.msrb.mxu1 %v261_v13 }
  0x33   :  { %308 = vmatpush.msrb.mxu2 %v246_v6 }
  0x34   :  { %287 = vmatpush.msrb.mxu1 %v260_v15 }
  0x35   :  { %309 = vmatpush.msrb.mxu2 %v245_v8 }
  0x36   :  { %288 = vmatpush.msrb.mxu1 %v259_v17  ;;  %421 = vmatmul.msk.f32.gmra.mxu3 %vm323_vm3, %v321_v19 }
  0x37   :  { %310 = vmatpush.msrb.mxu2 %v244_v10 }
  0x38   :  { %289 = vmatpush.msrb.mxu1 %v258_v18 }
  0x39   :  { %311 = vmatpush.msrb.mxu2 %v243_v12 }
  0x3b   :  { %312 = vmatpush.msrb.mxu2 %v242_v14 }
  0x94   :  { %v106_v20 = vpop.f32.mrf.mxu0 }
  0x96   :  { %v128_v21 = vpop.f32.mrf.mxu1 }
  0x97   :  { %v129_v23 = vadd.f32 %v128_v21, %v106_v20 }
  0x9c   :  { %v108_v22 = vpop.f32.mrf.mxu0 }
  0x9e   :  { %v130_v28 = vpop.f32.mrf.mxu1 }
  0x9f   :  { %v164_v24 = vpop.f32.mrf.mxu2  ;;  %v131_v30 = vadd.f32 %v130_v28, %v108_v22 }
  0xa0   :  { %v169_v25 = vadd.f32 %v164_v24, %v129_v23 }
  0xa1   :  { %v202_v26 = vpop.f32.mrf.mxu3 }
  0xa2   :  { %v207_v27 = vadd.f32 %v202_v26, %v169_v25 }
  0xa4   :  { %313 = vmatmul.f32.vlgmr.msrb.gmra.mxu2 %v207_v27  ;;  %v236_v29 = vpop.f32.mrf.mxu0 }
  0xa5   :  { %290 = vmatmul.f32.vlgmr.msrb.gmra.mxu1 %v236_v29 }
  0xa7   :  { %v166_v31 = vpop.f32.mrf.mxu2 }
  0xa8   :  { %v170_v32 = vadd.f32 %v166_v31, %v131_v30 }
  0xa9   :  { %v204_v33 = vpop.f32.mrf.mxu3 }
  0xaa   :  { %v208_v34 = vadd.f32 %v204_v33, %v170_v32 }
  0xac   :  { %316 = vmatmul.f32.gmra.mxu2 %v208_v34  ;;  %v239_v35 = vpop.f32.mrf.mxu0 }
  0xad   :  { %293 = vmatmul.f32.gmra.mxu1 %v239_v35 }
  0xb1   :  { %v351_v37 = vpop.f32.mrf.mxu3 }
  0xb9   :  { %v354_v47 = vpop.f32.mrf.mxu3 }
 0x122   :  { %v291_v36 = vpop.f32.mrf.mxu1 }
 0x127   :  { %v314_v38 = vpop.f32.mrf.mxu2 }
 0x128   :  { %v315_v39 = vadd.f32 %v314_v38, %v291_v36 }
 0x12a   :  { %v357_v41 = vadd.f32 %v351_v37, %v315_v39  ;;  %v294_v44 = vpop.f32.mrf.mxu1 }
 0x12c   :  { %v363_v42 = vadd.f32 %v436_v40, %v357_v41 }
 0x12e   :  { %v365_v45 = vmax.f32 %v363_v42, 0.0 }
 0x12f   :  { %v317_v46 = vpop.f32.mrf.mxu2 }
 0x130   :  { %v371_v48 = vadd.f32 %v437_v43, %v365_v45  ;;  %v318_v49 = vadd.f32 %v317_v46, %v294_v44 }
 0x132   :  { %v373_v50 = vmax.f32 %v371_v48, 0.0  ;;  %v358_v51 = vadd.f32 %v354_v47, %v318_v49 }
 0x134   :  { %375 = vst [vmem:[%s681_s11] sm:$0xff] %v373_v50  ;;  %v364_v52 = vadd.f32 %v436_v40, %v358_v51 }
 0x136   :  { %v366_v53 = vmax.f32 %v364_v52, 0.0 }
 0x138   :  { %v372_v54 = vadd.f32 %v437_v43, %v366_v53 }
 0x13a   :  { %v374_v55 = vmax.f32 %v372_v54, 0.0 }
 0x13c   :  { %376 = vst [vmem:[%s681_s11 + $0x8] sm:$0xff] %v374_v55 }
 0x13d   :  { %381 = vsyncpa [#allocation3], 1 }

// kernel: rgcn_2_forward.3
= control target key start
LH: loop header
LB: loop body
LE: loop exit
PB: predicated region body
PF: predicated region fallthrough
CT: control target
= control target key end

     0   :  { %16 = vsyncpa [#allocation3], 0  ;;  %s458_s20 = smov [#allocation2]   ;;  %s718_s0 = inlined_call_operand.vmem [shape: bf16[4,16,16], index: 0, kind: input, shape index: {}]   ;;  %s719_s1 = inlined_call_operand.vmem [shape: bf16[2,16,128], index: 1, kind: input, shape index: {}]   ;;  %s720_s2 = inlined_call_operand.vmem [shape: f32[16,128], index: 2, kind: input, shape index: {}]   ;;  %s721_s3 = inlined_call_operand.vmem [shape: f32[16,4], index: 3, kind: input, shape index: {}]   ;;  %s722_s4 = inlined_call_operand.vmem [shape: f32[4,2], index: 4, kind: input, shape index: {}]   ;;  %s723_s5 = inlined_call_operand.vmem [shape: f32[128,128], index: 5, kind: input, shape index: {}]   ;;  %s724_s6 = inlined_call_operand.vmem [shape: f32[128,128], index: 6, kind: input, shape index: {}]   ;;  %s725_s7 = inlined_call_operand.vmem [shape: f32[128,128], index: 7, kind: input, shape index: {}]   ;;  %s726_s8 = inlined_call_operand.vmem [shape: f32[4,128], index: 8, kind: input, shape index: {}]   ;;  %s727_s9 = inlined_call_operand.vmem [shape: f32[1,128], index: 9, kind: input, shape index: {}]   ;;  %s728_s10 = inlined_call_operand.vmem [shape: f32[1,128], index: 10, kind: input, shape index: {}]   ;;  %s729_s11 = inlined_call_operand.vmem [shape: f32[16,128], index: 11, kind: output, shape index: {}]  }
   0x1   :  { %s30_s19 = sshll.u32 %s722_s4, 4  ;;  %s31_s19 = int_to_ptr.vmem [resolvable:$true] %s30_s19 }
   0x2   :  { %33 = dma.vmem_to_smem %s31_s19, 64, %s458_s20, [#allocation3]  }
   0x3   :  { %456 = dma.done.wait [#allocation3], 64  }
   0x4   :  { %457 = vsyncadd [#allocation3], 4294967232 }
   0x5   :  { %50 = sfence }
   0x6   :  { %v433_v0 = vld [vmem:[%s719_s1] sm:$0xff]   ;;  %s393_s23 = sld [smem:[#allocation2 + $0x80]]  ;;  %v440_v1 = vld [vmem:[%s719_s1 + $0x8] sm:$0xff]   ;;  %v226_v25 = vld [vmem:[%s723_s5 + $0x78] sm:$0xff]  ;;  %vm93_vm0 = vcmask 130048   ;;  %vm338_vm1 = vcmask 1043456  }
   0x7   :  { %s394_s26 = sld [smem:[#allocation2 + $0x81]]  ;;  %v434_v2 = vunpack.c.l.bf16 %v433_v0  ;;  %v435_v3 = vunpack.c.h.bf16 %v433_v0  ;;  %v438_v4 = vunpack.c.l.bf16 %v440_v1  ;;  %v439_v5 = vunpack.c.h.bf16 %v440_v1  ;;  %v225_v32 = vld [vmem:[%s723_s5 + $0x70] sm:$0xff]  ;;  %v429_v36 = vld [vmem:[%s718_s0 + $0x8] sm:$0xff]  ;;  %v431_v46 = vld [vmem:[%s718_s0 + $0x18] sm:$0xff] }
   0x8   :  { %s407_s27 = sld [smem:[#allocation2 + $0x100]]  ;;  %v430_v39 = vld [vmem:[%s718_s0 + $0x10] sm:$0xff]  ;;  %v224_v45 = vld [vmem:[%s723_s5 + $0x68] sm:$0xff]  ;;  %v223_v48 = vld [vmem:[%s723_s5 + $0x60] sm:$0xff]  ;;  %vm331_vm2 = vcmask 31744  }
   0x9   :  { %s408_s4 = sld [smem:[#allocation2 + $0x101]]  ;;  %v428_v49 = vld [vmem:[%s718_s0] sm:$0xff]  ;;  %v222_v50 = vld [vmem:[%s723_s5 + $0x58] sm:$0xff]  ;;  %v221_v51 = vld [vmem:[%s723_s5 + $0x50] sm:$0xff] }
   0xa   :  { %s416_s28 = sld [smem:[#allocation2 + $0x180]]  ;;  %v265_v52 = vld [vmem:[%s724_s6 + $0x78] sm:$0xff]  ;;  %v264_v53 = vld [vmem:[%s724_s6 + $0x70] sm:$0xff]  ;;  %v220_v54 = vld [vmem:[%s723_s5 + $0x48] sm:$0xff] }
   0xb   :  { %s417_s29 = sld [smem:[#allocation2 + $0x181]]  ;;  %v263_v55 = vld [vmem:[%s724_s6 + $0x68] sm:$0xff]  ;;  %v281_v56 = vld [vmem:[%s725_s7 + $0x78] sm:$0xff]  ;;  %v280_v57 = vld [vmem:[%s725_s7 + $0x70] sm:$0xff] }
   0xc   :  { %v75_v6 = vstv %s393_s23  ;;  %s52_s30 = sld [smem:[#allocation2]]  ;;  %v219_v58 = vld [vmem:[%s723_s5 + $0x40] sm:$0xff]  ;;  %v279_v60 = vld [vmem:[%s725_s7 + $0x68] sm:$0xff]  ;;  %v218_v61 = vld [vmem:[%s723_s5 + $0x38] sm:$0xff] }
   0xd   :  { %v76_v7 = vmul.f32 %v434_v2, %v75_v6  ;;  %v77_v8 = vmul.f32 %v435_v3, %v75_v6  ;;  %v79_v9 = vstv %s394_s26  ;;  %s528_s12 = sld [smem:[#allocation2 + $0x1]]  ;;  %v262_v59 = vld [vmem:[%s724_s6 + $0x60] sm:$0xff]  ;;  %v261_v62 = vld [vmem:[%s724_s6 + $0x58] sm:$0xff]  ;;  %v217_v63 = vld [vmem:[%s723_s5 + $0x30] sm:$0xff] }
   0xe   :  { %v80_v10 = vmul.f32 %v438_v4, %v79_v9  ;;  %v81_v11 = vmul.f32 %v439_v5, %v79_v9  ;;  %v134_v12 = vstv %s407_s27  ;;  %v260_v0 = vld [vmem:[%s724_s6 + $0x50] sm:$0xff]  ;;  %v216_v1 = vld [vmem:[%s723_s5 + $0x28] sm:$0xff]  ;;  %v257_v6 = vld [vmem:[%s724_s6 + $0x38] sm:$0xff] }
   0xf   :  { %v135_v13 = vmul.f32 %v434_v2, %v134_v12  ;;  %v136_v14 = vmul.f32 %v435_v3, %v134_v12  ;;  %v138_v15 = vstv %s408_s4  ;;  %v212_v9 = vld [vmem:[%s723_s5 + $0x8] sm:$0xff]  ;;  %v209_v12 = vld [vmem:[%s720_s2] sm:$0xff] }
  0x10   :  { %v82_v16 = vadd.f32 %v80_v10, %v76_v7  ;;  %v83_v17 = vadd.f32 %v81_v11, %v77_v8  ;;  %v139_v18 = vmul.f32 %v438_v4, %v138_v15  ;;  %v140_v19 = vmul.f32 %v439_v5, %v138_v15  ;;  %v213_v7 = vld [vmem:[%s723_s5 + $0x10] sm:$0xff]  ;;  %v255_v10 = vld [vmem:[%s724_s6 + $0x28] sm:$0xff]  ;;  %v211_v11 = vld [vmem:[%s723_s5] sm:$0xff] }
  0x11   :  { %v172_v20 = vstv %s416_s28  ;;  %v176_v21 = vstv %s417_s29  ;;  %v256_v8 = vld [vmem:[%s724_s6 + $0x30] sm:$0xff]  ;;  %v278_v15 = vld [vmem:[%s725_s7 + $0x60] sm:$0xff] }
  0x12   :  { %v87_v22 = vpack.c.bf16 %v83_v17, %v82_v16  ;;  %v141_v23 = vadd.f32 %v139_v18, %v135_v13  ;;  %v142_v24 = vadd.f32 %v140_v19, %v136_v14  ;;  %v173_v26 = vmul.f32 %v434_v2, %v172_v20  ;;  %v254_v13 = vld [vmem:[%s724_s6 + $0x20] sm:$0xff]  ;;  %v210_v14 = vld [vmem:[%s720_s2 + $0x8] sm:$0xff]  ;;  %v253_v16 = vld [vmem:[%s724_s6 + $0x18] sm:$0xff] }
  0x13   :  { %v174_v27 = vmul.f32 %v435_v3, %v172_v20  ;;  %v177_v28 = vmul.f32 %v438_v4, %v176_v21  ;;  %v178_v29 = vmul.f32 %v439_v5, %v176_v21  ;;  %v57_v30 = vstv %s52_s30  ;;  %v277_v17 = vld [vmem:[%s725_s7 + $0x58] sm:$0xff]  ;;  %v252_v18 = vld [vmem:[%s724_s6 + $0x10] sm:$0xff]  ;;  %v251_v20 = vld [vmem:[%s724_s6 + $0x8] sm:$0xff] }
  0x14   :  { %104 = vmatpush.bf16.msra.mxu0 %v87_v22  ;;  %v146_v31 = vpack.c.bf16 %v142_v24, %v141_v23  ;;  %v58_v33 = vmul.f32 %v434_v2, %v57_v30  ;;  %v59_v34 = vmul.f32 %v435_v3, %v57_v30  ;;  %v66_v35 = vstv %s528_s12  ;;  %v259_v2 = vld [vmem:[%s724_s6 + $0x48] sm:$0xff]  ;;  %v215_v3 = vld [vmem:[%s723_s5 + $0x20] sm:$0xff]  ;;  %v276_v19 = vld [vmem:[%s725_s7 + $0x50] sm:$0xff] }
  0x15   :  { %v179_v37 = vadd.f32 %v177_v28, %v173_v26  ;;  %v180_v38 = vadd.f32 %v178_v29, %v174_v27  ;;  %v67_v40 = vmul.f32 %v438_v4, %v66_v35  ;;  %v68_v41 = vmul.f32 %v439_v5, %v66_v35  ;;  %v258_v4 = vld [vmem:[%s724_s6 + $0x40] sm:$0xff]  ;;  %v214_v5 = vld [vmem:[%s723_s5 + $0x18] sm:$0xff]  ;;  %v275_v22 = vld [vmem:[%s725_s7 + $0x48] sm:$0xff] }
  0x16   :  { %162 = vmatpush.bf16.msra.mxu2 %v146_v31  ;;  %v330_v21 = vld [vmem:[%s726_s8] sm:$0xf]  ;;  %v272_v26 = vld [vmem:[%s725_s7 + $0x30] sm:$0xff]  ;;  %v271_v27 = vld [vmem:[%s725_s7 + $0x28] sm:$0xff] }
  0x17   :  { %v184_v42 = vpack.c.bf16 %v180_v38, %v179_v37  ;;  %v69_v43 = vadd.f32 %v67_v40, %v58_v33  ;;  %v70_v44 = vadd.f32 %v68_v41, %v59_v34  ;;  %401 = vmatmul.msk.bf16.vlgmr.msra.gmra.mxu0 %vm93_vm0, %v429_v36  ;;  %v250_v23 = vld [vmem:[%s724_s6] sm:$0xff]  ;;  %v269_v29 = vld [vmem:[%s725_s7 + $0x18] sm:$0xff]  ;;  %v268_v31 = vld [vmem:[%s725_s7 + $0x10] sm:$0xff] }
  0x18   :  { %227 = vmatpush.msrb.mxu0 %v226_v25  ;;  %v274_v24 = vld [vmem:[%s725_s7 + $0x40] sm:$0xff]  ;;  %v273_v25 = vld [vmem:[%s725_s7 + $0x38] sm:$0xff]  ;;  %v329_v34 = vld [vmem:[%s721_s3 + $0x8] sm:$0xff] }
  0x19   :  { %200 = vmatpush.bf16.msra.mxu3 %v184_v42  ;;  %415 = vmatmul.msk.bf16.vlgmr.msra.gmra.mxu2 %vm93_vm0, %v430_v39  ;;  %v73_v47 = vpack.c.bf16 %v70_v44, %v69_v43  ;;  %v270_v28 = vld [vmem:[%s725_s7 + $0x20] sm:$0xff] }
  0x1a   :  { %228 = vmatpush.msrb.mxu0 %v225_v32  ;;  %305 = vmatpush.msrb.mxu2 %v265_v52  ;;  %v328_v30 = vld [vmem:[%s721_s3] sm:$0xff]  ;;  %v267_v32 = vld [vmem:[%s725_s7 + $0x8] sm:$0xff] }
  0x1b   :  { %126 = vmatpush.bf16.msra.mxu1 %v73_v47  ;;  %v266_v33 = vld [vmem:[%s725_s7] sm:$0xff] }
  0x1c   :  { %229 = vmatpush.msrb.mxu0 %v224_v45  ;;  %424 = vmatmul.msk.bf16.vlgmr.msra.gmra.mxu3 %vm93_vm0, %v431_v46 }
  0x1d   :  { %306 = vmatpush.msrb.mxu2 %v264_v53  ;;  %425 = vmatpush.msk.msrb.mxu3 %vm338_vm1, %v330_v21 }
  0x1e   :  { %230 = vmatpush.msrb.mxu0 %v223_v48  ;;  %406 = vmatmul.msk.bf16.vlgmr.msra.gmra.mxu1 %vm93_vm0, %v428_v49 }
  0x1f   :  { %282 = vmatpush.msrb.mxu1 %v281_v56  ;;  %307 = vmatpush.msrb.mxu2 %v263_v55  ;;  %v442_v55 = vld [vmem:[%s727_s9] ss:$0 sm:$0xff] }
  0x20   :  { %231 = vmatpush.msrb.mxu0 %v222_v50 }
  0x21   :  { %283 = vmatpush.msrb.mxu1 %v280_v57  ;;  %308 = vmatpush.msrb.mxu2 %v262_v59 }
  0x22   :  { %232 = vmatpush.msrb.mxu0 %v221_v51 }
  0x23   :  { %284 = vmatpush.msrb.mxu1 %v279_v60  ;;  %309 = vmatpush.msrb.mxu2 %v261_v62 }
  0x24   :  { %233 = vmatpush.msrb.mxu0 %v220_v54 }
  0x25   :  { %310 = vmatpush.msrb.mxu2 %v260_v0  ;;  %285 = vmatpush.msrb.mxu1 %v278_v15 }
  0x26   :  { %234 = vmatpush.msrb.mxu0 %v219_v58  ;;  %v443_v58 = vld [vmem:[%s728_s10] ss:$0 sm:$0xff] }
  0x27   :  { %311 = vmatpush.msrb.mxu2 %v259_v2  ;;  %286 = vmatpush.msrb.mxu1 %v277_v17 }
  0x28   :  { %235 = vmatpush.msrb.mxu0 %v218_v61 }
  0x29   :  { %312 = vmatpush.msrb.mxu2 %v258_v4  ;;  %287 = vmatpush.msrb.mxu1 %v276_v19 }
  0x2a   :  { %236 = vmatpush.msrb.mxu0 %v217_v63 }
  0x2b   :  { %313 = vmatpush.msrb.mxu2 %v257_v6  ;;  %288 = vmatpush.msrb.mxu1 %v275_v22 }
  0x2c   :  { %237 = vmatpush.msrb.mxu0 %v216_v1  ;;  %426 = vmatmul.msk.f32.vlgmr.msrb.gmra.mxu3 %vm331_vm2, %v328_v30 }
  0x2d   :  { %314 = vmatpush.msrb.mxu2 %v256_v8  ;;  %289 = vmatpush.msrb.mxu1 %v274_v24 }
  0x2e   :  { %238 = vmatpush.msrb.mxu0 %v215_v3 }
  0x2f   :  { %315 = vmatpush.msrb.mxu2 %v255_v10  ;;  %290 = vmatpush.msrb.mxu1 %v273_v25 }
  0x30   :  { %239 = vmatpush.msrb.mxu0 %v214_v5 }
  0x31   :  { %316 = vmatpush.msrb.mxu2 %v254_v13  ;;  %291 = vmatpush.msrb.mxu1 %v272_v26 }
  0x32   :  { %240 = vmatpush.msrb.mxu0 %v213_v7 }
  0x33   :  { %317 = vmatpush.msrb.mxu2 %v253_v16  ;;  %292 = vmatpush.msrb.mxu1 %v271_v27 }
  0x34   :  { %241 = vmatpush.msrb.mxu0 %v212_v9  ;;  %427 = vmatmul.msk.f32.gmra.mxu3 %vm331_vm2, %v329_v34 }
  0x35   :  { %318 = vmatpush.msrb.mxu2 %v252_v18  ;;  %293 = vmatpush.msrb.mxu1 %v270_v28 }
  0x36   :  { %242 = vmatpush.msrb.mxu0 %v211_v11 }
  0x37   :  { %243 = vmatmul.f32.vlgmr.msrb.gmra.mxu0 %v209_v12  ;;  %319 = vmatpush.msrb.mxu2 %v251_v20 }
  0x38   :  { %294 = vmatpush.msrb.mxu1 %v269_v29 }
  0x39   :  { %320 = vmatpush.msrb.mxu2 %v250_v23 }
  0x3a   :  { %295 = vmatpush.msrb.mxu1 %v268_v31 }
  0x3c   :  { %296 = vmatpush.msrb.mxu1 %v267_v32 }
  0x3e   :  { %297 = vmatpush.msrb.mxu1 %v266_v33 }
  0x3f   :  { %246 = vmatmul.f32.gmra.mxu0 %v210_v14 }
  0x94   :  { %v106_v35 = vpop.f32.mrf.mxu0 }
  0x9b   :  { %v128_v36 = vpop.f32.mrf.mxu1 }
  0x9c   :  { %v129_v37 = vadd.f32 %v128_v36, %v106_v35  ;;  %v164_v38 = vpop.f32.mrf.mxu2  ;;  %v108_v42 = vpop.f32.mrf.mxu0 }
  0x9e   :  { %v169_v39 = vadd.f32 %v164_v38, %v129_v37 }
  0x9f   :  { %v202_v40 = vpop.f32.mrf.mxu3 }
  0xa0   :  { %v207_v41 = vadd.f32 %v202_v40, %v169_v39 }
  0xa2   :  { %321 = vmatmul.f32.vlgmr.msrb.gmra.mxu2 %v207_v41 }
  0xa3   :  { %v130_v43 = vpop.f32.mrf.mxu1 }
  0xa4   :  { %v131_v44 = vadd.f32 %v130_v43, %v108_v42  ;;  %v166_v45 = vpop.f32.mrf.mxu2 }
  0xa6   :  { %v170_v46 = vadd.f32 %v166_v45, %v131_v44 }
  0xa7   :  { %v204_v47 = vpop.f32.mrf.mxu3 }
  0xa8   :  { %v208_v48 = vadd.f32 %v204_v47, %v170_v46 }
  0xaa   :  { %324 = vmatmul.f32.gmra.mxu2 %v208_v48 }
  0xaf   :  { %v359_v51 = vpop.f32.mrf.mxu3 }
  0xb4   :  { %v244_v49 = vpop.f32.mrf.mxu0 }
  0xb5   :  { %298 = vmatmul.f32.vlgmr.msrb.gmra.mxu1 %v244_v49 }
  0xb7   :  { %v362_v60 = vpop.f32.mrf.mxu3 }
  0xbc   :  { %v247_v50 = vpop.f32.mrf.mxu0 }
  0xbd   :  { %301 = vmatmul.f32.gmra.mxu1 %v247_v50 }
 0x125   :  { %v322_v52 = vpop.f32.mrf.mxu2 }
 0x12d   :  { %v325_v61 = vpop.f32.mrf.mxu2 }
 0x132   :  { %v299_v53 = vpop.f32.mrf.mxu1 }
 0x133   :  { %v323_v54 = vadd.f32 %v322_v52, %v299_v53 }
 0x135   :  { %v365_v56 = vadd.f32 %v359_v51, %v323_v54 }
 0x137   :  { %v371_v57 = vadd.f32 %v442_v55, %v365_v56 }
 0x139   :  { %v373_v59 = vmax.f32 %v371_v57, 0.0 }
 0x13a   :  { %v302_v62 = vpop.f32.mrf.mxu1 }
 0x13b   :  { %v379_v63 = vadd.f32 %v443_v58, %v373_v59  ;;  %v326_v0 = vadd.f32 %v325_v61, %v302_v62 }
 0x13d   :  { %v381_v1 = vmax.f32 %v379_v63, 0.0  ;;  %v366_v2 = vadd.f32 %v362_v60, %v326_v0 }
 0x13f   :  { %383 = vst [vmem:[%s729_s11] sm:$0xff] %v381_v1  ;;  %v372_v3 = vadd.f32 %v442_v55, %v366_v2 }
 0x141   :  { %v374_v4 = vmax.f32 %v372_v3, 0.0 }
 0x143   :  { %v380_v5 = vadd.f32 %v443_v58, %v374_v4 }
 0x145   :  { %v382_v6 = vmax.f32 %v380_v5, 0.0 }
 0x147   :  { %384 = vst [vmem:[%s729_s11 + $0x8] sm:$0xff] %v382_v6 }
 0x148   :  { %389 = vsyncpa [#allocation3], 1 }

</bundles_post_ra>
